<compile_context>
chip_gen: v7x
topology: tpu7x:2x2x1
jax: 0.10.0
libtpu: 0.0.40
codegen_flags: <defaults>
</compile_context>

<pallas_src>
import functools

import jax
import jax.numpy as jnp
from jax import lax
from jax.experimental import pallas as pl
from jax.experimental.pallas import tpu as pltpu

LANES = 128
MAX_TILE_ROWS = 2048       # 2048 * 128 * 4 B = 1 MiB per f32 input block
EPS = 1e-8


def _disc_loss_kernel(real_ref, fake_ref, out_ref, acc_ref, *,
                      n_elements, n_rows, tile_rows, needs_mask):
    # Zero the vector accumulator on the first grid step.
    @pl.when(pl.program_id(0) == 0)
    def _():
        acc_ref[...] = jnp.zeros_like(acc_ref)

    r = real_ref[...].astype(jnp.float32)
    f = fake_ref[...].astype(jnp.float32)
    # Fused: log(r + eps) + log(1 - f + eps) == log((r + eps) * (1 - f + eps))
    term = jnp.log((r + EPS) * (1.0 - f + EPS))

    if needs_mask:
        # Only the final (partial) row-block can contain out-of-range rows;
        # zero their contribution.  (Lane padding is handled by neutral pad
        # values in the wrapper, so only a row mask is needed.)
        row_ids = (pl.program_id(0) * tile_rows
                   + lax.broadcasted_iota(jnp.int32, term.shape, 0))
        term = jnp.where(row_ids < n_rows, term, 0.0)

    # Sublane-only reduce into the (1, 128) VMEM accumulator (VPU-dominated).
    acc_ref[...] += jnp.sum(term, axis=0, keepdims=True)

    # Finalize: one cross-lane reduce, negate, divide by true element count.
    @pl.when(pl.program_id(0) == pl.num_programs(0) - 1)
    def _():
        total = jnp.sum(acc_ref[...], axis=1, keepdims=True)   # (1, 1)
        out_ref[...] = -total / jnp.float32(n_elements)


def discriminator_loss(predict_real, predict_fake, *, max_tile_rows=MAX_TILE_ROWS):
    """Pallas equivalent of DiscriminatorLoss.forward. Returns an f32 scalar."""
    assert predict_real.shape == predict_fake.shape
    n_elements = predict_real.size

    real = predict_real.reshape(-1)
    fake = predict_fake.reshape(-1)

    # Pad only to the next multiple of 128 lanes (at most 127 elements), with
    # values that contribute exactly log(1) = 0 in f32:
    #   real pad = 1 -> (1 + eps) rounds to 1;  fake pad = 0 -> (1 - 0 + eps) rounds to 1.
    rem = n_elements % LANES
    if rem:
        pad = LANES - rem
        real = jnp.pad(real, (0, pad), constant_values=1)
        fake = jnp.pad(fake, (0, pad), constant_values=0)

    rows = real.size // LANES
    real2d = real.reshape(rows, LANES)
    fake2d = fake.reshape(rows, LANES)

    tile_rows = min(max_tile_rows, rows)          # full-dim block for small inputs
    grid = (pl.cdiv(rows, tile_rows),)
    needs_mask = (rows % tile_rows) != 0          # only partial row-blocks need masking

    kernel = functools.partial(
        _disc_loss_kernel,
        n_elements=n_elements, n_rows=rows,
        tile_rows=tile_rows, needs_mask=needs_mask)

    bytes_accessed = (real2d.size * real2d.dtype.itemsize
                      + fake2d.size * fake2d.dtype.itemsize + 4)
    cost = pl.CostEstimate(flops=5 * n_elements,
                           transcendentals=n_elements,
                           bytes_accessed=bytes_accessed)

    out = pl.pallas_call(
        kernel,
        out_shape=jax.ShapeDtypeStruct((1, 1), jnp.float32),
        grid_spec=pltpu.PrefetchScalarGridSpec(
            num_scalar_prefetch=0,
            grid=grid,
            in_specs=[
                pl.BlockSpec((tile_rows, LANES), lambda i: (i, 0)),
                pl.BlockSpec((tile_rows, LANES), lambda i: (i, 0)),
            ],
            out_specs=pl.BlockSpec((1, 1), lambda i: (0, 0)),
            scratch_shapes=[pltpu.VMEM((1, LANES), jnp.float32)],
        ),
        compiler_params=pltpu.CompilerParams(
            dimension_semantics=("arbitrary",)),
        cost_estimate=cost,
    )(real2d, fake2d)
    return out[0, 0]


def _ref_loss(predict_real, predict_fake):
    r = predict_real.astype(jnp.float32)
    f = predict_fake.astype(jnp.float32)
    return -jnp.mean(jnp.log(r + EPS) + jnp.log(1.0 - f + EPS))


if __name__ == "__main__":
    key = jax.random.PRNGKey(0)
    k1, k2, k3, k4, k5, k6 = jax.random.split(key, 6)

    # 1) Discriminator outputs, (B, C, H, W) = (2, 4, 16, 16), f32 in (0, 1).
    shape = (2, 4, 16, 16)
    pr = jax.random.uniform(k1, shape, jnp.float32, 0.05, 0.95)
    pf = jax.random.uniform(k2, shape, jnp.float32, 0.05, 0.95)
    loss = jax.block_until_ready(discriminator_loss(pr, pf))
    ref = _ref_loss(pr, pf)
    assert jnp.allclose(loss, ref, rtol=1e-5, atol=1e-5), (loss, ref)

    # 2) Element count not a multiple of 128 -> exercises neutral lane padding.
    shape2 = (5, 7, 11)  # 385 elements
    pr2 = jax.random.uniform(k3, shape2, jnp.float32, 0.05, 0.95)
    pf2 = jax.random.uniform(k4, shape2, jnp.float32, 0.05, 0.95)
    loss2 = jax.block_until_ready(discriminator_loss(pr2, pf2))
    ref2 = _ref_loss(pr2, pf2)
    assert jnp.allclose(loss2, ref2, rtol=1e-5, atol=1e-5), (loss2, ref2)

    # 3) Multi-step grid with a partial final row-block -> exercises in-kernel
    #    row masking (small max_tile_rows just for this test).
    shape3 = (3, 6, 8, 16)  # 2304 elements = 18 rows of 128
    pr3 = jax.random.uniform(k5, shape3, jnp.float32, 0.05, 0.95)
    pf3 = jax.random.uniform(k6, shape3, jnp.float32, 0.05, 0.95)
    loss3 = jax.block_until_ready(discriminator_loss(pr3, pf3, max_tile_rows=8))
    ref3 = _ref_loss(pr3, pf3)
    assert jnp.allclose(loss3, ref3, rtol=1e-5, atol=1e-5), (loss3, ref3)

    # 4) bf16 inputs fed directly (no wrapper-side f32 cast; widened in-kernel).
    pr4 = pr.astype(jnp.bfloat16)
    pf4 = pf.astype(jnp.bfloat16)
    loss4 = jax.block_until_ready(discriminator_loss(pr4, pf4))
    ref4 = _ref_loss(pr4, pf4)
    assert jnp.allclose(loss4, ref4, rtol=1e-5, atol=1e-5), (loss4, ref4)

    print("KERNEL_OK")
</pallas_src>

<mosaic_0001>
module attributes {stable_mosaic.version = 11 : i64} {
  func.func @_disc_loss_kernel(%arg0: i32, %arg1: memref<16x128xf32, #tpu.memory_space<vmem>>, %arg2: memref<16x128xf32, #tpu.memory_space<vmem>>, %arg3: memref<1x1xf32, #tpu.memory_space<vmem>>, %arg4: memref<1x128xf32, #tpu.memory_space<vmem>>) attributes {dimension_semantics = [#tpu.dimension_semantics<arbitrary>], iteration_bounds = array<i64: 1>, scalar_prefetch = 0 : i64, scratch_operands = 1 : i64, tpu.core_type = #tpu.core_type<tc>, window_params = [{transform_indices = @transform_0, window_bounds = array<i64: 16, 128>}, {transform_indices = @transform_1, window_bounds = array<i64: 16, 128>}, {pipeline_mode = #tpu.pipeline_mode<synchronous>, transform_indices = @transform_2, window_bounds = array<i64: 1, 1>}]} {
    %c0_i32 = arith.constant 0 : i32
    %0 = arith.cmpi eq, %arg0, %c0_i32 : i32
    %1 = arith.extui %0 : i1 to i32
    %c0_i32_0 = arith.constant 0 : i32
    %2 = arith.cmpi ne, %1, %c0_i32_0 : i32
    scf.if %2 {
      %cst_13 = arith.constant 0.000000e+00 : f32
      %21 = vector.broadcast %cst_13 : f32 to vector<1x128xf32>
      %c0_14 = arith.constant 0 : index
      %c0_15 = arith.constant 0 : index
      %22 = vector.load %arg4[%c0_14, %c0_15] : memref<1x128xf32, #tpu.memory_space<vmem>>, vector<1x128xf32>
      tpu.vector_store %arg4[%c0_14, %c0_15], %21 {strides = array<i32>} : memref<1x128xf32, #tpu.memory_space<vmem>>, vector<1x128xf32>,
    } else {
    }
    %c0 = arith.constant 0 : index
    %c0_1 = arith.constant 0 : index
    %3 = vector.load %arg1[%c0, %c0_1] : memref<16x128xf32, #tpu.memory_space<vmem>>, vector<16x128xf32>
    %c0_2 = arith.constant 0 : index
    %c0_3 = arith.constant 0 : index
    %4 = vector.load %arg2[%c0_2, %c0_3] : memref<16x128xf32, #tpu.memory_space<vmem>>, vector<16x128xf32>
    %cst = arith.constant 9.99999993E-9 : f32
    %5 = vector.broadcast %cst : f32 to vector<16x128xf32>
    %6 = arith.addf %3, %5 : vector<16x128xf32>
    %cst_4 = arith.constant 1.000000e+00 : f32
    %7 = vector.broadcast %cst_4 : f32 to vector<16x128xf32>
    %8 = arith.subf %7, %4 : vector<16x128xf32>
    %cst_5 = arith.constant 9.99999993E-9 : f32
    %9 = vector.broadcast %cst_5 : f32 to vector<16x128xf32>
    %10 = arith.addf %8, %9 : vector<16x128xf32>
    %11 = arith.mulf %6, %10 : vector<16x128xf32>
    %12 = math.log %11 : vector<16x128xf32>
    %c0_6 = arith.constant 0 : index
    %c0_7 = arith.constant 0 : index
    %13 = vector.load %arg4[%c0_6, %c0_7] : memref<1x128xf32, #tpu.memory_space<vmem>>, vector<1x128xf32>
    %cst_8 = arith.constant dense<0.000000e+00> : vector<128xf32>
    %14 = vector.multi_reduction <add>, %12, %cst_8 [0] : vector<16x128xf32> to vector<128xf32>
    %15 = vector.shape_cast %14 : vector<128xf32> to vector<1x128xf32>
    %16 = arith.addf %13, %15 : vector<1x128xf32>
    %c0_9 = arith.constant 0 : index
    %c0_10 = arith.constant 0 : index
    %17 = vector.load %arg4[%c0_9, %c0_10] : memref<1x128xf32, #tpu.memory_space<vmem>>, vector<1x128xf32>
    tpu.vector_store %arg4[%c0_9, %c0_10], %16 {strides = array<i32>} : memref<1x128xf32, #tpu.memory_space<vmem>>, vector<1x128xf32>,
    %c0_i32_11 = arith.constant 0 : i32
    %18 = arith.cmpi eq, %arg0, %c0_i32_11 : i32
    %19 = arith.extui %18 : i1 to i32
    %c0_i32_12 = arith.constant 0 : i32
    %20 = arith.cmpi ne, %19, %c0_i32_12 : i32
    scf.if %20 {
      %c0_13 = arith.constant 0 : index
      %c0_14 = arith.constant 0 : index
      %21 = vector.load %arg4[%c0_13, %c0_14] : memref<1x128xf32, #tpu.memory_space<vmem>>, vector<1x128xf32>
      %cst_15 = arith.constant dense<0.000000e+00> : vector<1xf32>
      %22 = vector.multi_reduction <add>, %21, %cst_15 [1] : vector<1x128xf32> to vector<1xf32>
      %23 = vector.shape_cast %22 : vector<1xf32> to vector<1x1xf32>
      %cst_16 = arith.constant 0.000000e+00 : f32
      %24 = vector.broadcast %cst_16 : f32 to vector<1x1xf32>
      %25 = arith.subf %24, %23 : vector<1x1xf32>
      %cst_17 = arith.constant 2.048000e+03 : f32
      %26 = vector.broadcast %cst_17 : f32 to vector<1x1xf32>
      %27 = arith.divf %25, %26 : vector<1x1xf32>
      %c0_18 = arith.constant 0 : index
      %c0_19 = arith.constant 0 : index
      %28 = vector.load %arg3[%c0_18, %c0_19] : memref<1x1xf32, #tpu.memory_space<vmem>>, vector<1x1xf32>
      tpu.vector_store %arg3[%c0_18, %c0_19], %27 {strides = array<i32>} : memref<1x1xf32, #tpu.memory_space<vmem>>, vector<1x1xf32>,
    } else {
    }
    return
  }
  func.func @transform_0(%arg0: i32) -> (i32, i32) {
    %c0_i32 = arith.constant 0 : i32
    %c0_i32_0 = arith.constant 0 : i32
    return %arg0, %c0_i32 : i32, i32
  }
  func.func @transform_1(%arg0: i32) -> (i32, i32) {
    %c0_i32 = arith.constant 0 : i32
    %c0_i32_0 = arith.constant 0 : i32
    return %arg0, %c0_i32 : i32, i32
  }
  func.func @transform_2(%arg0: i32) -> (i32, i32) {
    %c0_i32 = arith.constant 0 : i32
    %c0_i32_0 = arith.constant 0 : i32
    %c0_i32_1 = arith.constant 0 : i32
    return %c0_i32, %c0_i32_0 : i32, i32
  }
}

</mosaic_0001>

<bundles_post_ra>
// kernel: tpu_custom_call.1
= control target key start
LH: loop header
LB: loop body
LE: loop exit
PB: predicated region body
PF: predicated region fallthrough
CT: control target
= control target key end

     0   :  { %7 = vsyncpa [#allocation4], 0  ;;  %s239_s0 = inlined_call_operand.hbm [shape: f32[16,128], index: 0, kind: input, shape index: {}]   ;;  %s240_s1 = inlined_call_operand.hbm [shape: f32[16,128], index: 1, kind: input, shape index: {}]   ;;  %s241_s2 = inlined_call_operand.hbm [shape: f32[1,1], index: 2, kind: output, shape index: {}]  }
   0x1   :  { %8 = vsyncpa [#allocation7], 0 }
   0x2   :  { %9 = vsyncpa [#allocation5], 0  ;;  %s182_s9 = smov [#allocation3]   ;;  %s110_s13 = scalar_lea.hbm %s239_s0, 256 }
   0x3   :  { %s15_s10 = sshll.u32 %s182_s9, 4  ;;  %p111_p0 = scmp.ne.s32.totalorder %s239_s0, %s110_s13  ;;  %s16_s10 = int_to_ptr.vmem [resolvable:$true] %s15_s10 }
   0x4   :  { %p114_p1 = scmp.lt.u32.totalorder %s110_s13, %s239_s0 }
   0x6   :  { %p116_p2 = pnand %p114_p1, %p111_p0 }
   0x8   :  { %119 = shalt.err (!%p116_p2)
}
   0x9   :  { %s120_s18 = scalar_lea.vmem %s16_s10, 256  ;;  %p125_p4 = scmp.lt.s32.totalorder %s16_s10, %s16_s10 }
   0xa   :  { %p121_p3 = scmp.ne.s32.totalorder %s16_s10, %s120_s18  ;;  %p126_p5 = scmp.lt.s32.totalorder %s120_s18, %s120_s18 }
   0xc   :  { %p127_p6 = por %p126_p5, %p125_p4 }
   0xe   :  { %p128_p7 = pnand %p127_p6, %p121_p3 }
  0x10   :  { %131 = shalt.err (!%p128_p7)
}
  0x11   :  { %s183_s19 = smov 128   ;;  %s184_s20 = smov 8  }
  0x12   :  { %21 = dma.hbm_to_vmem [thread:$0]  %s239_s0, 256, %s16_s10, [#allocation4], %s183_s19, %s183_s19, %s184_s20  }
  0x13   :  { %s185_s23 = smov [#allocation6]   ;;  %s132_s27 = scalar_lea.hbm %s240_s1, 256 }
  0x14   :  { %s27_s24 = sshll.u32 %s185_s23, 4  ;;  %p133_p8 = scmp.ne.s32.totalorder %s240_s1, %s132_s27  ;;  %s28_s24 = int_to_ptr.vmem [resolvable:$true] %s27_s24 }
  0x15   :  { %p136_p9 = scmp.lt.u32.totalorder %s132_s27, %s240_s1 }
  0x17   :  { %p138_p10 = pnand %p136_p9, %p133_p8 }
  0x19   :  { %141 = shalt.err (!%p138_p10)
}
  0x1a   :  { %s142_s4 = scalar_lea.vmem %s28_s24, 256  ;;  %p147_p12 = scmp.lt.s32.totalorder %s28_s24, %s28_s24 }
  0x1b   :  { %p143_p11 = scmp.ne.s32.totalorder %s28_s24, %s142_s4  ;;  %p148_p13 = scmp.lt.s32.totalorder %s142_s4, %s142_s4 }
  0x1d   :  { %p149_p0 = por %p148_p13, %p147_p12 }
  0x1f   :  { %p150_p1 = pnand %p149_p0, %p143_p11 }
  0x21   :  { %153 = shalt.err (!%p150_p1)
}
  0x22   :  { %33 = dma.hbm_to_vmem [thread:$0]  %s240_s1, 256, %s28_s24, [#allocation7], %s183_s19, %s183_s19, %s184_s20  }
  0x23   :  { %176 = dma.done.wait [#allocation4], 256  }
  0x24   :  { %177 = vsyncadd [#allocation4], 4294967040 }
  0x25   :  { %178 = dma.done.wait [#allocation7], 256  }
  0x26   :  { %179 = vsyncadd [#allocation7], 4294967040  ;;  %v186_v0 = vmov 0.0   ;;  %v45_v1 = vld [vmem:[#allocation3] sm:$0xff]  ;;  %v46_v2 = vld [vmem:[#allocation3 + $0x8] sm:$0xff]  ;;  %vm75_vm0 = vcmask 1040384  }
  0x27   :  { %44 = vst [vmem:[#allocation2] sm:$0x1] %v186_v0  ;;  %v47_v3 = vld [vmem:[#allocation6] sm:$0xff]  ;;  %v48_v4 = vld [vmem:[#allocation6 + $0x8] sm:$0xff]  ;;  %v49_v5 = vadd.f32 1e-08, %v45_v1 }
  0x28   :  { %v51_v6 = vsub.f32 1.0, %v47_v3  ;;  %v50_v7 = vadd.f32 1e-08, %v46_v2  ;;  %v52_v8 = vsub.f32 1.0, %v48_v4  ;;  %s187_s1 = smov [#allocation8]   ;;  %vm82_vm1 = vcmask 0  }
  0x29   :  { %s90_s6 = sshll.u32 %s187_s1, 4  ;;  %s91_s6 = int_to_ptr.vmem [resolvable:$true] %s90_s6 }
  0x2a   :  { %v53_v9 = vadd.f32 1e-08, %v51_v6  ;;  %v54_v10 = vadd.f32 1e-08, %v52_v8  ;;  %s154_s7 = scalar_lea.vmem %s91_s6, 16  ;;  %s158_s8 = scalar_lea.vmem %s91_s6, 32 }
  0x2b   :  { %p155_p2 = scmp.ne.s32.totalorder %s91_s6, %s154_s7  ;;  %p159_p3 = scmp.lt.s32.totalorder %s91_s6, %s91_s6 }
  0x2c   :  { %v55_v11 = vmul.f32 %v53_v9, %v49_v5  ;;  %v56_v12 = vmul.f32 %v54_v10, %v50_v7  ;;  %p160_p4 = scmp.lt.s32.totalorder %s158_s8, %s154_s7 }
  0x2e   :  { %106 = vlog2.f32 %v55_v11  ;;  %v61_v23 = vld [vmem:[#allocation2] sm:$0x1]  ;;  %p161_p5 = por %p160_p4, %p159_p3 }
  0x2f   :  { %108 = vlog2.f32 %v56_v12 }
  0x30   :  { %p162_p6 = pnand %p161_p5, %p155_p2 }
  0x38   :  { %v107_v13 = vpop.eup %106 }
  0x39   :  { %v109_v14 = vpop.eup %108  ;;  %v58_v15 = vmul.f32 0.6931472, %v107_v13 }
  0x3a   :  { %v60_v16 = vmul.f32 0.6931472, %v109_v14 }
  0x3c   :  { %v62_v17 = vadd.f32 %v60_v16, %v58_v15 }
  0x3e   :  { %v63_v18 = vrot.slane %v62_v17, 4 }
  0x40   :  { %v64_v19 = vadd.f32 %v63_v18, %v62_v17 }
  0x42   :  { %v65_v20 = vrot.slane %v64_v19, 2 }
  0x44   :  { %v66_v21 = vadd.f32 %v65_v20, %v64_v19 }
  0x46   :  { %v67_v22 = vrot.slane %v66_v21, 1 }
  0x48   :  { %v68_v24 = vadd.f32 %v67_v22, %v66_v21 }
  0x4a   :  { %v69_v25 = vadd.f32 %v68_v24, %v61_v23 }
  0x4c   :  { %70 = vst [vmem:[#allocation2] sm:$0x1] %v69_v25 }
  0x53   :  { %v74_v26 = vld [vmem:[#allocation2] sm:$0x1] }
  0x54   :  { %v76_v27 = vsel %vm75_vm0, %v74_v26, 0.0 }
  0x55   :  { %77 = vadd.xlane.f32.xlu0 %v76_v27 }
  0xe2   :  { %v78_v28 = vpop.xlane.xlu0 %77 }
  0xe3   :  { %v79_v29 = vsub.f32 0.0, %v78_v28 }
  0xe5   :  { %v81_v30 = vmul.f32 0.00048828125, %v79_v29 }
  0xe7   :  { %83 = vst.msk [vmem:[#allocation8] sm:$0x1] %vm82_vm1, %v81_v30 }
  0xe8   :  { %165 = shalt.err (!%p162_p6)
}
  0xe9   :  { %s166_s11 = scalar_lea.hbm %s241_s2, 16 }
  0xea   :  { %p167_p7 = scmp.ne.s32.totalorder %s241_s2, %s166_s11  ;;  %p170_p8 = scmp.lt.u32.totalorder %s166_s11, %s241_s2 }
  0xec   :  { %p172_p9 = pnand %p170_p8, %p167_p7 }
  0xee   :  { %175 = shalt.err (!%p172_p9)
}
  0xef   :  { %93 = dma.vmem_to_hbm [thread:$0]  %s91_s6, 16, %s241_s2, [#allocation5]  }
  0xf0   :  { %180 = dma.done.wait [#allocation5], 16  }
  0xf1   :  { %181 = vsyncadd [#allocation5], 4294967280 }
  0xf2   :  { %97 = vsyncpa [#allocation4], 1 }
  0xf3   :  { %98 = vsyncpa [#allocation7], 1 }
  0xf4   :  { %99 = vsyncpa [#allocation5], 1 }

</bundles_post_ra>
